<compile_context>
chip_gen: v5e
topology: v5e:2x2
jax: 0.10.0
libtpu: 0.0.40
codegen_flags: <defaults>
</compile_context>

<pallas_src>
from functools import partial

import jax
import jax.numpy as jnp
from jax.experimental import pallas as pl
from jax.experimental.pallas import tpu as pltpu


_MAX_TILE_M = 512  # rows per block once the problem grows; tiny VMEM footprint


def _round_up(x, m):
    return ((x + m - 1) // m) * m


def conv_tanh_kernel(p_ref, w_ref, b_ref, o_ref):
    # p_ref: (TILE_M, K_pad)  im2col patches
    # w_ref: (K_pad, OC_pad)  reshaped conv weight (resident across the grid)
    # b_ref: (1,     OC_pad)  bias
    acc = jnp.dot(p_ref[...], w_ref[...], preferred_element_type=jnp.float32)
    o_ref[...] = jnp.tanh(acc + b_ref[...])


def prepare_weights(weight, bias):
    """One-time prep: (OC, C, KH, KW) -> padded (K_pad, OC_pad) matmul operand.

    Call once and reuse the returned (w_p, b_p) across forward calls so the
    per-call jitted graph contains no weight re-padding ops.
    """
    OC, C, KH, KW = weight.shape
    K = C * KH * KW
    K_pad = _round_up(K, 128)      # lane-dense MXU operands (review item)
    OC_pad = _round_up(OC, 128)    # lane-dense, unmasked output stores
    w_mat = weight.reshape(OC, K).T                                  # (K, OC)
    w_p = jnp.pad(w_mat, ((0, K_pad - K), (0, OC_pad - OC)))
    b_p = jnp.pad(bias[None, :].astype(jnp.float32), ((0, 0), (0, OC_pad - OC)))
    return w_p.astype(jnp.float32), b_p


@partial(jax.jit,
         static_argnames=("kernel_size", "stride", "padding", "out_channels", "nchw"))
def conv2d_tanh_pallas(x, w_p, b_p, *, kernel_size, stride, padding,
                       out_channels, nchw=True):
    """x: (N, C, H, W) f32; w_p/b_p: padded slabs from prepare_weights().

    Returns NCHW (PyTorch semantics) by default; nchw=False returns NHWC and
    skips the post-kernel layout copy entirely.
    """
    N, C, H, W = x.shape
    KH = KW = kernel_size
    OC = out_channels
    S = stride
    OH = (H + 2 * padding - KH) // S + 1
    OW = (W + 2 * padding - KW) // S + 1

    # ---- patch extraction (fused under jit; no Python per-window loop) ----
    # Column ordering is (c, kh, kw) -- matches PyTorch's weight.reshape(OC, C*KH*KW).
    if S == KH and S == KW:
        # Non-overlapping windows: pure slice + reshape + transpose.
        x_pad = jnp.pad(x, ((0, 0), (0, 0), (padding, padding), (padding, padding)))
        x_crop = x_pad[:, :, :OH * S, :OW * S]                 # (N, C, OH*KH, OW*KW)
        patches = x_crop.reshape(N, C, OH, KH, OW, KW)
        patches = patches.transpose(0, 2, 4, 1, 3, 5)          # (N, OH, OW, C, KH, KW)
        patches = patches.reshape(N * OH * OW, C * KH * KW)    # (M, K)
    else:
        # General (overlapping-window) fallback: one XLA op.
        pt = jax.lax.conv_general_dilated_patches(
            x, filter_shape=(KH, KW), window_strides=(S, S),
            padding=((padding, padding), (padding, padding)),
            dimension_numbers=("NCHW", "OIHW", "NCHW"))        # (N, C*KH*KW, OH, OW)
        patches = pt.transpose(0, 2, 3, 1).reshape(N * OH * OW, C * KH * KW)

    M, K = patches.shape
    K_pad, OC_pad = w_p.shape

    # ---- M tiling: single block at small sizes, parallel grid when scaled up ----
    TILE_M = min(_round_up(M, 8), _MAX_TILE_M)
    M_pad = _round_up(M, TILE_M)
    grid_m = M_pad // TILE_M

    p_p = jnp.pad(patches.astype(jnp.float32), ((0, M_pad - M), (0, K_pad - K)))

    cost = pl.CostEstimate(
        flops=2 * M_pad * K_pad * OC_pad,
        transcendentals=M_pad * OC_pad,
        bytes_accessed=4 * (M_pad * K_pad + K_pad * OC_pad + OC_pad + M_pad * OC_pad),
    )

    out_pad = pl.pallas_call(
        conv_tanh_kernel,
        out_shape=jax.ShapeDtypeStruct((M_pad, OC_pad), jnp.float32),
        grid=(grid_m,),
        in_specs=[
            pl.BlockSpec((TILE_M, K_pad), lambda i: (i, 0)),
            pl.BlockSpec((K_pad, OC_pad), lambda i: (0, 0)),
            pl.BlockSpec((1, OC_pad), lambda i: (0, 0)),
        ],
        out_specs=pl.BlockSpec((TILE_M, OC_pad), lambda i: (i, 0)),
        compiler_params=pltpu.CompilerParams(
            dimension_semantics=("parallel",)),
        cost_estimate=cost,
    )(p_p, w_p, b_p)

    out = out_pad[:M, :OC].reshape(N, OH, OW, OC)              # NHWC, lane-dense
    if not nchw:
        return out
    # NCHW to match the PyTorch module's output layout.
    return out.transpose(0, 3, 1, 2)


if __name__ == "__main__":
    key = jax.random.PRNGKey(0)
    kx, kw, kb = jax.random.split(key, 3)

    # Shapes from the PyTorch module / its example input.
    x = jax.random.normal(kx, (1, 3, 32, 32), jnp.float32)
    weight = jax.random.normal(kw, (7, 3, 5, 5), jnp.float32) * 0.1
    bias = jax.random.normal(kb, (7,), jnp.float32) * 0.1

    # One-time weight prep (reused across calls).
    w_p, b_p = prepare_weights(weight, bias)

    y = conv2d_tanh_pallas(x, w_p, b_p, kernel_size=5, stride=5, padding=1,
                           out_channels=7, nchw=True)
    jax.block_until_ready(y)
    assert y.shape == (1, 7, 6, 6), y.shape

    # NHWC fast path (skips the layout copy) should match too.
    y_nhwc = conv2d_tanh_pallas(x, w_p, b_p, kernel_size=5, stride=5, padding=1,
                                out_channels=7, nchw=False)
    jax.block_until_ready(y_nhwc)
    assert y_nhwc.shape == (1, 6, 6, 7), y_nhwc.shape

    # Reference check against XLA conv + tanh.
    ref = jax.lax.conv_general_dilated(
        x, weight, window_strides=(5, 5), padding=((1, 1), (1, 1)),
        dimension_numbers=("NCHW", "OIHW", "NCHW"))
    ref = jnp.tanh(ref + bias[None, :, None, None])
    assert jnp.allclose(y, ref, atol=1e-5, rtol=1e-5)
    assert jnp.allclose(y_nhwc.transpose(0, 3, 1, 2), ref, atol=1e-5, rtol=1e-5)

    print("KERNEL_OK")
</pallas_src>

<mosaic_0001>
module attributes {stable_mosaic.version = 11 : i64} {
  func.func @conv_tanh_kernel(%arg0: i32, %arg1: memref<40x128xf32, #tpu.memory_space<vmem>>, %arg2: memref<128x128xf32, #tpu.memory_space<vmem>>, %arg3: memref<1x128xf32, #tpu.memory_space<vmem>>, %arg4: memref<40x128xf32, #tpu.memory_space<vmem>>) attributes {dimension_semantics = [#tpu.dimension_semantics<parallel>], iteration_bounds = array<i64: 1>, scalar_prefetch = 0 : i64, scratch_operands = 0 : i64, tpu.core_type = #tpu.core_type<tc>, window_params = [{transform_indices = @transform_0, window_bounds = array<i64: 40, 128>}, {pipeline_mode = #tpu.pipeline_mode<synchronous>, transform_indices = @transform_1, window_bounds = array<i64: 128, 128>}, {pipeline_mode = #tpu.pipeline_mode<synchronous>, transform_indices = @transform_2, window_bounds = array<i64: 1, 128>}, {transform_indices = @transform_3, window_bounds = array<i64: 40, 128>}]} {
    %c0 = arith.constant 0 : index
    %c0_0 = arith.constant 0 : index
    %0 = vector.load %arg1[%c0, %c0_0] : memref<40x128xf32, #tpu.memory_space<vmem>>, vector<40x128xf32>
    %c0_1 = arith.constant 0 : index
    %c0_2 = arith.constant 0 : index
    %1 = vector.load %arg2[%c0_1, %c0_2] : memref<128x128xf32, #tpu.memory_space<vmem>>, vector<128x128xf32>
    %cst = arith.constant dense<0.000000e+00> : vector<40x128xf32>
    %2 = tpu.matmul %0, %1, %cst {dimension_numbers = #tpu.dot_dimension_numbers<[1], [0], [0], [1], [0, 0, 1, 1], [], []>} : vector<40x128xf32>, vector<128x128xf32>, vector<40x128xf32> -> vector<40x128xf32>
    %c0_3 = arith.constant 0 : index
    %c0_4 = arith.constant 0 : index
    %3 = vector.load %arg3[%c0_3, %c0_4] : memref<1x128xf32, #tpu.memory_space<vmem>>, vector<1x128xf32>
    %4 = vector.broadcast %3 : vector<1x128xf32> to vector<40x128xf32>
    %5 = arith.addf %2, %4 : vector<40x128xf32>
    %6 = math.tanh %5 : vector<40x128xf32>
    %c0_5 = arith.constant 0 : index
    %c0_6 = arith.constant 0 : index
    %7 = vector.load %arg4[%c0_5, %c0_6] : memref<40x128xf32, #tpu.memory_space<vmem>>, vector<40x128xf32>
    tpu.vector_store %arg4[%c0_5, %c0_6], %6 {strides = array<i32>} : memref<40x128xf32, #tpu.memory_space<vmem>>, vector<40x128xf32>,
    return
  }
  func.func @transform_0(%arg0: i32) -> (i32, i32) {
    %c0_i32 = arith.constant 0 : i32
    %c0_i32_0 = arith.constant 0 : i32
    return %arg0, %c0_i32 : i32, i32
  }
  func.func @transform_1(%arg0: i32) -> (i32, i32) {
    %c0_i32 = arith.constant 0 : i32
    %c0_i32_0 = arith.constant 0 : i32
    %c0_i32_1 = arith.constant 0 : i32
    return %c0_i32, %c0_i32_0 : i32, i32
  }
  func.func @transform_2(%arg0: i32) -> (i32, i32) {
    %c0_i32 = arith.constant 0 : i32
    %c0_i32_0 = arith.constant 0 : i32
    %c0_i32_1 = arith.constant 0 : i32
    return %c0_i32, %c0_i32_0 : i32, i32
  }
  func.func @transform_3(%arg0: i32) -> (i32, i32) {
    %c0_i32 = arith.constant 0 : i32
    %c0_i32_0 = arith.constant 0 : i32
    return %arg0, %c0_i32 : i32, i32
  }
}

</mosaic_0001>

<bundles_post_ra>
// kernel: conv2d_tanh_pallas.1
= control target key start
LH: loop header
LB: loop body
LE: loop exit
PB: predicated region body
PF: predicated region fallthrough
CT: control target
= control target key end

     0   :  { %s245_s1 = inlined_call_operand.vmem [shape: f32[128,128], index: 1, kind: input, shape index: {}]   ;;  %s246_s2 = inlined_call_operand.vmem [shape: f32[1,128], index: 2, kind: input, shape index: {}]   ;;  %s247_s0 = inlined_call_operand.vmem [shape: f32[40,128], index: 0, kind: input, shape index: {}]   ;;  %s248_s3 = inlined_call_operand.vmem [shape: f32[40,128], index: 3, kind: output, shape index: {}]  }
   0x1   :  { %v34_v0 = vld [vmem:[%s245_s1 + $0x78] sm:$0xff]  ;;  %v33_v1 = vld [vmem:[%s245_s1 + $0x70] sm:$0xff]  ;;  %v32_v2 = vld [vmem:[%s245_s1 + $0x68] sm:$0xff] }
   0x2   :  { %87 = vmatpush.msra.mxu3 %v34_v0  ;;  %86 = vmatpush.msra.mxu2 %v34_v0  ;;  %v31_v3 = vld [vmem:[%s245_s1 + $0x60] sm:$0xff]  ;;  %v30_v4 = vld [vmem:[%s245_s1 + $0x58] sm:$0xff]  ;;  %v29_v5 = vld [vmem:[%s245_s1 + $0x50] sm:$0xff] }
   0x3   :  { %39 = vmatpush.msra.mxu0 %v34_v0  ;;  %85 = vmatpush.msra.mxu1 %v34_v0  ;;  %v28_v6 = vld [vmem:[%s245_s1 + $0x48] sm:$0xff]  ;;  %v27_v7 = vld [vmem:[%s245_s1 + $0x40] sm:$0xff]  ;;  %v26_v8 = vld [vmem:[%s245_s1 + $0x38] sm:$0xff] }
   0x4   :  { %90 = vmatpush.msra.mxu3 %v33_v1  ;;  %89 = vmatpush.msra.mxu2 %v33_v1  ;;  %v25_v9 = vld [vmem:[%s245_s1 + $0x30] sm:$0xff]  ;;  %v24_v10 = vld [vmem:[%s245_s1 + $0x28] sm:$0xff]  ;;  %v23_v11 = vld [vmem:[%s245_s1 + $0x20] sm:$0xff] }
   0x5   :  { %40 = vmatpush.msra.mxu0 %v33_v1  ;;  %88 = vmatpush.msra.mxu1 %v33_v1  ;;  %v22_v12 = vld [vmem:[%s245_s1 + $0x18] sm:$0xff]  ;;  %v21_v13 = vld [vmem:[%s245_s1 + $0x10] sm:$0xff]  ;;  %v20_v14 = vld [vmem:[%s245_s1 + $0x8] sm:$0xff] }
   0x6   :  { %93 = vmatpush.msra.mxu3 %v32_v2  ;;  %92 = vmatpush.msra.mxu2 %v32_v2  ;;  %v19_v15 = vld [vmem:[%s245_s1] sm:$0xff]  ;;  %v17_v16 = vld [vmem:[%s247_s0 + $0x18] sm:$0xff]  ;;  %v16_v17 = vld [vmem:[%s247_s0 + $0x10] sm:$0xff] }
   0x7   :  { %41 = vmatpush.msra.mxu0 %v32_v2  ;;  %91 = vmatpush.msra.mxu1 %v32_v2  ;;  %v14_v18 = vld [vmem:[%s247_s0] sm:$0xff]  ;;  %v15_v19 = vld [vmem:[%s247_s0 + $0x8] sm:$0xff] }
   0x8   :  { %96 = vmatpush.msra.mxu3 %v31_v3  ;;  %95 = vmatpush.msra.mxu2 %v31_v3  ;;  %v18_v20 = vld [vmem:[%s247_s0 + $0x20] sm:$0xff] }
   0x9   :  { %42 = vmatpush.msra.mxu0 %v31_v3  ;;  %94 = vmatpush.msra.mxu1 %v31_v3  ;;  %v133_v21 = vld [vmem:[%s246_s2] ss:$0 sm:$0xff] }
   0xa   :  { %99 = vmatpush.msra.mxu3 %v30_v4  ;;  %98 = vmatpush.msra.mxu2 %v30_v4 }
   0xb   :  { %43 = vmatpush.msra.mxu0 %v30_v4  ;;  %97 = vmatpush.msra.mxu1 %v30_v4 }
   0xc   :  { %102 = vmatpush.msra.mxu3 %v29_v5  ;;  %101 = vmatpush.msra.mxu2 %v29_v5 }
   0xd   :  { %44 = vmatpush.msra.mxu0 %v29_v5  ;;  %100 = vmatpush.msra.mxu1 %v29_v5 }
   0xe   :  { %105 = vmatpush.msra.mxu3 %v28_v6  ;;  %104 = vmatpush.msra.mxu2 %v28_v6 }
   0xf   :  { %45 = vmatpush.msra.mxu0 %v28_v6  ;;  %103 = vmatpush.msra.mxu1 %v28_v6 }
  0x10   :  { %108 = vmatpush.msra.mxu3 %v27_v7  ;;  %107 = vmatpush.msra.mxu2 %v27_v7 }
  0x11   :  { %46 = vmatpush.msra.mxu0 %v27_v7  ;;  %106 = vmatpush.msra.mxu1 %v27_v7 }
  0x12   :  { %111 = vmatpush.msra.mxu3 %v26_v8  ;;  %110 = vmatpush.msra.mxu2 %v26_v8 }
  0x13   :  { %47 = vmatpush.msra.mxu0 %v26_v8  ;;  %109 = vmatpush.msra.mxu1 %v26_v8 }
  0x14   :  { %114 = vmatpush.msra.mxu3 %v25_v9  ;;  %113 = vmatpush.msra.mxu2 %v25_v9 }
  0x15   :  { %48 = vmatpush.msra.mxu0 %v25_v9  ;;  %112 = vmatpush.msra.mxu1 %v25_v9 }
  0x16   :  { %117 = vmatpush.msra.mxu3 %v24_v10  ;;  %116 = vmatpush.msra.mxu2 %v24_v10 }
  0x17   :  { %49 = vmatpush.msra.mxu0 %v24_v10  ;;  %115 = vmatpush.msra.mxu1 %v24_v10 }
  0x18   :  { %120 = vmatpush.msra.mxu3 %v23_v11  ;;  %119 = vmatpush.msra.mxu2 %v23_v11 }
  0x19   :  { %50 = vmatpush.msra.mxu0 %v23_v11  ;;  %118 = vmatpush.msra.mxu1 %v23_v11 }
  0x1a   :  { %123 = vmatpush.msra.mxu3 %v22_v12  ;;  %122 = vmatpush.msra.mxu2 %v22_v12 }
  0x1b   :  { %51 = vmatpush.msra.mxu0 %v22_v12  ;;  %121 = vmatpush.msra.mxu1 %v22_v12 }
  0x1c   :  { %126 = vmatpush.msra.mxu3 %v21_v13  ;;  %125 = vmatpush.msra.mxu2 %v21_v13 }
  0x1d   :  { %52 = vmatpush.msra.mxu0 %v21_v13  ;;  %124 = vmatpush.msra.mxu1 %v21_v13 }
  0x1e   :  { %129 = vmatpush.msra.mxu3 %v20_v14  ;;  %128 = vmatpush.msra.mxu2 %v20_v14 }
  0x1f   :  { %53 = vmatpush.msra.mxu0 %v20_v14  ;;  %127 = vmatpush.msra.mxu1 %v20_v14 }
  0x20   :  { %132 = vmatpush.msra.mxu3 %v19_v15  ;;  %131 = vmatpush.msra.mxu2 %v19_v15 }
  0x21   :  { %64 = vmatmul.f32.vlgmr.msra.gmra.mxu3 %v17_v16  ;;  %61 = vmatmul.f32.vlgmr.msra.gmra.mxu2 %v16_v17 }
  0x22   :  { %54 = vmatpush.msra.mxu0 %v19_v15  ;;  %130 = vmatpush.msra.mxu1 %v19_v15 }
  0x23   :  { %55 = vmatmul.f32.vlgmr.msra.gmra.mxu0 %v14_v18  ;;  %58 = vmatmul.f32.vlgmr.msra.gmra.mxu1 %v15_v19 }
  0x29   :  { %67 = vmatmul.f32.gmra.mxu3 %v18_v20 }
  0xa0   :  { %v56_v22 = vpop.f32.mrf.mxu0  ;;  %v59_v23 = vpop.f32.mrf.mxu1 }
  0xa1   :  { %v57_v24 = vadd.f32 %v133_v21, %v56_v22  ;;  %v60_v25 = vadd.f32 %v133_v21, %v59_v23 }
  0xa3   :  { %134 = vtanh.f32 %v57_v24 }
  0xa4   :  { %v65_v26 = vpop.f32.mrf.mxu3  ;;  %136 = vtanh.f32 %v60_v25  ;;  %v62_v27 = vpop.f32.mrf.mxu2 }
  0xa5   :  { %v66_v28 = vadd.f32 %v133_v21, %v65_v26  ;;  %v63_v29 = vadd.f32 %v133_v21, %v62_v27 }
  0xa7   :  { %138 = vtanh.f32 %v66_v28 }
  0xa8   :  { %140 = vtanh.f32 %v63_v29 }
  0xa9   :  { %v135_v30 = vpop.eup %134 }
  0xaa   :  { %v137_v31 = vpop.eup %136  ;;  %76 = vst [vmem:[%s248_s3] sm:$0xff] %v135_v30 }
  0xab   :  { %77 = vst [vmem:[%s248_s3 + $0x8] sm:$0xff] %v137_v31 }
  0xac   :  { %v68_v32 = vpop.f32.mrf.mxu3 }
  0xad   :  { %v139_v33 = vpop.eup %138  ;;  %v69_v34 = vadd.f32 %v133_v21, %v68_v32 }
  0xae   :  { %v141_v35 = vpop.eup %140  ;;  %79 = vst [vmem:[%s248_s3 + $0x18] sm:$0xff] %v139_v33 }
  0xaf   :  { %78 = vst [vmem:[%s248_s3 + $0x10] sm:$0xff] %v141_v35  ;;  %142 = vtanh.f32 %v69_v34 }
  0xb5   :  { %v143_v36 = vpop.eup %142 }
  0xb6   :  { %80 = vst [vmem:[%s248_s3 + $0x20] sm:$0xff] %v143_v36 }

</bundles_post_ra>
